<compile_context>
chip_gen: v7x
topology: tpu7x:2x2x1
jax: 0.10.0
libtpu: 0.0.40
codegen_flags: <defaults>
</compile_context>

<pallas_src>
import jax
import jax.numpy as jnp
from jax.experimental import pallas as pl
from jax.experimental.pallas import tpu as pltpu


def _round_up(n, m):
    return ((n + m - 1) // m) * m


def _ln_relu(y, gamma, beta, eps=1e-5):
    # Fused single-pass statistics (f32): mean and mean-of-squares together.
    mu = jnp.mean(y, axis=-1, keepdims=True)
    ms = jnp.mean(y * y, axis=-1, keepdims=True)
    var = ms - mu * mu
    z = (y - mu) * jax.lax.rsqrt(var + eps) * gamma + beta
    return jnp.maximum(z, 0.0)


def decoder_mlp_kernel(
    x_ref,
    w1_ref, b1_ref, g1_ref, be1_ref,
    w2_ref, b2_ref, g2_ref, be2_ref,
    w3_ref, b3_ref, g3_ref, be3_ref,
    w4_ref, b4_ref,
    o_ref,
):
    cdt = w1_ref.dtype  # bf16 compute dtype for the MXU inputs

    # fc1 -> ln1 -> relu   (bf16 matmul, f32 accumulation + f32 epilogue)
    h = jnp.dot(x_ref[...], w1_ref[...], preferred_element_type=jnp.float32)
    h = _ln_relu(h + b1_ref[...], g1_ref[...], be1_ref[...])

    # fc2 -> ln2 -> relu
    h = jnp.dot(h.astype(cdt), w2_ref[...], preferred_element_type=jnp.float32)
    h = _ln_relu(h + b2_ref[...], g2_ref[...], be2_ref[...])

    # fc3 -> ln3 -> relu
    h = jnp.dot(h.astype(cdt), w3_ref[...], preferred_element_type=jnp.float32)
    h = _ln_relu(h + b3_ref[...], g3_ref[...], be3_ref[...])

    # fc4 (no activation); output columns zero-padded to 128 lanes -> dense vst
    h = jnp.dot(h.astype(cdt), w4_ref[...], preferred_element_type=jnp.float32)
    o_ref[...] = (h + b4_ref[...]).astype(o_ref.dtype)


def decoder_mlp(h, s, params, *, batch_tile=None, compute_dtype=jnp.bfloat16):
    """params: dict of weights (in,out); biases / LN params as (1, dim) f32."""
    assert h.shape[-1] == s.shape[-1], (
        f"Hidden and state sizes must match! Got {h.shape[-1]} vs {s.shape[-1]}"
    )
    x = jnp.concatenate([h, s], axis=-1).astype(compute_dtype)  # glue in plain JAX
    B, in_dim = x.shape
    out_dim = params["w4"].shape[1]
    out_pad = max(128, _round_up(out_dim, 128))  # lane-dense output store

    # bf16 matmul operands; biases / LN params stay f32 (epilogue math is f32).
    w1 = params["w1"].astype(compute_dtype)
    w2 = params["w2"].astype(compute_dtype)
    w3 = params["w3"].astype(compute_dtype)
    w4 = jnp.pad(params["w4"].astype(compute_dtype),
                 ((0, 0), (0, out_pad - out_dim)))
    b1, g1, be1 = params["b1"], params["g1"], params["be1"]
    b2, g2, be2 = params["b2"], params["g2"], params["be2"]
    b3, g3, be3 = params["b3"], params["g3"], params["be3"]
    b4 = jnp.pad(params["b4"], ((0, 0), (0, out_pad - out_dim)))

    consts = [w1, b1, g1, be1, w2, b2, g2, be2, w3, b3, g3, be3, w4, b4]
    const_bytes = sum(int(a.size) * a.dtype.itemsize for a in consts)
    widest = max(w1.shape[1], w2.shape[1], w3.shape[1], out_pad, in_dim)
    x_itemsize = jnp.dtype(compute_dtype).itemsize

    def vmem_estimate(tb):
        io = 2 * tb * in_dim * x_itemsize + 2 * tb * out_pad * 4  # dbl-buffered tiles
        act = 4 * tb * widest * 4                                  # f32 working-set slack
        return 2 * const_bytes + io + act

    # Batch tile: >=256 rows when the batch allows (feeds the 256-wide MXU),
    # always a multiple of 8 sublanes, shrunk if the VMEM budget (v7x) is tight.
    if batch_tile is None:
        tb = min(256, _round_up(B, 8))
    else:
        tb = batch_tile
    assert tb % 8 == 0, "batch_tile must be a multiple of 8 sublanes"
    while tb > 8 and vmem_estimate(tb) > (48 << 20):
        tb = max(8, (tb // 2) // 8 * 8)

    num_steps = -(-B // tb)
    if num_steps > 1 and num_steps % 2 == 1:
        num_steps += 1  # even grid -> clean split across v7x's 2 TensorCores
    B_pad = num_steps * tb
    if B_pad != B:
        x = jnp.pad(x, ((0, B_pad - B), (0, 0)))

    vmem_limit = int(min(max(vmem_estimate(tb) + (4 << 20), 32 << 20), 96 << 20))

    def full(arr):
        # whole-array block, resident across the batch grid (constant index)
        return pl.BlockSpec(arr.shape, lambda i: (0,) * arr.ndim)

    in_specs = [
        pl.BlockSpec((tb, in_dim), lambda i: (i, 0)),
        full(w1), full(b1), full(g1), full(be1),
        full(w2), full(b2), full(g2), full(be2),
        full(w3), full(b3), full(g3), full(be3),
        full(w4), full(b4),
    ]
    out_spec = pl.BlockSpec((tb, out_pad), lambda i: (i, 0))

    out_padded = pl.pallas_call(
        decoder_mlp_kernel,
        out_shape=jax.ShapeDtypeStruct((B_pad, out_pad), jnp.float32),
        grid_spec=pltpu.PrefetchScalarGridSpec(
            num_scalar_prefetch=0,
            grid=(num_steps,),
            in_specs=in_specs,
            out_specs=out_spec,
        ),
        compiler_params=pltpu.CompilerParams(
            dimension_semantics=("parallel",),
            vmem_limit_bytes=vmem_limit,
        ),
    )(x, *consts)

    return out_padded[:B, :out_dim]


def init_params(key, hidden_size, state_size, output_dim, embedding_size):
    """Deterministic synthetic init mirroring the PyTorch module:
    xavier_normal_ on Linear weights, zeros on biases, LayerNorm gamma=1 beta=0.
    Weights stored transposed (in, out) so the kernel does x @ W."""
    dims = [
        (hidden_size + state_size, embedding_size),
        (embedding_size, embedding_size // 2),
        (embedding_size // 2, embedding_size // 4),
        (embedding_size // 4, output_dim),
    ]
    params = {}
    keys = jax.random.split(key, len(dims))
    for idx, ((fan_in, fan_out), k) in enumerate(zip(dims, keys), start=1):
        std = (2.0 / (fan_in + fan_out)) ** 0.5
        params[f"w{idx}"] = std * jax.random.normal(k, (fan_in, fan_out), jnp.float32)
        params[f"b{idx}"] = jnp.zeros((1, fan_out), jnp.float32)
        if idx <= 3:
            params[f"g{idx}"] = jnp.ones((1, fan_out), jnp.float32)
            params[f"be{idx}"] = jnp.zeros((1, fan_out), jnp.float32)
    return params


if __name__ == "__main__":
    # Small shapes consistent with the module: hidden == state (forward asserts it).
    hidden_size = 32
    state_size = 32
    embedding_size = 32   # -> 32, 16, 8 through the MLP
    output_dim = 4
    batch = 8

    key = jax.random.PRNGKey(0)
    kh, ks, kp = jax.random.split(key, 3)
    h = jax.random.normal(kh, (batch, hidden_size), jnp.float32)
    s = jax.random.normal(ks, (batch, state_size), jnp.float32)
    params = init_params(kp, hidden_size, state_size, output_dim, embedding_size)

    out = decoder_mlp(h, s, params)
    out = jax.block_until_ready(out)
    assert out.shape == (batch, output_dim), out.shape
    assert jnp.all(jnp.isfinite(out))
    print("KERNEL_OK")
</pallas_src>

<mosaic_0001>
module attributes {stable_mosaic.version = 11 : i64} {
  func.func @decoder_mlp_kernel(%arg0: i32, %arg1: memref<8x64xbf16, #tpu.memory_space<vmem>>, %arg2: memref<64x32xbf16, #tpu.memory_space<vmem>>, %arg3: memref<1x32xf32, #tpu.memory_space<vmem>>, %arg4: memref<1x32xf32, #tpu.memory_space<vmem>>, %arg5: memref<1x32xf32, #tpu.memory_space<vmem>>, %arg6: memref<32x16xbf16, #tpu.memory_space<vmem>>, %arg7: memref<1x16xf32, #tpu.memory_space<vmem>>, %arg8: memref<1x16xf32, #tpu.memory_space<vmem>>, %arg9: memref<1x16xf32, #tpu.memory_space<vmem>>, %arg10: memref<16x8xbf16, #tpu.memory_space<vmem>>, %arg11: memref<1x8xf32, #tpu.memory_space<vmem>>, %arg12: memref<1x8xf32, #tpu.memory_space<vmem>>, %arg13: memref<1x8xf32, #tpu.memory_space<vmem>>, %arg14: memref<8x128xbf16, #tpu.memory_space<vmem>>, %arg15: memref<1x128xf32, #tpu.memory_space<vmem>>, %arg16: memref<8x128xf32, #tpu.memory_space<vmem>>) attributes {dimension_semantics = [#tpu.dimension_semantics<parallel>], iteration_bounds = array<i64: 1>, scalar_prefetch = 0 : i64, scratch_operands = 0 : i64, tpu.core_type = #tpu.core_type<tc>, window_params = [{transform_indices = @transform_0, window_bounds = array<i64: 8, 64>}, {pipeline_mode = #tpu.pipeline_mode<synchronous>, transform_indices = @transform_1, window_bounds = array<i64: 64, 32>}, {pipeline_mode = #tpu.pipeline_mode<synchronous>, transform_indices = @transform_2, window_bounds = array<i64: 1, 32>}, {pipeline_mode = #tpu.pipeline_mode<synchronous>, transform_indices = @transform_3, window_bounds = array<i64: 1, 32>}, {pipeline_mode = #tpu.pipeline_mode<synchronous>, transform_indices = @transform_4, window_bounds = array<i64: 1, 32>}, {pipeline_mode = #tpu.pipeline_mode<synchronous>, transform_indices = @transform_5, window_bounds = array<i64: 32, 16>}, {pipeline_mode = #tpu.pipeline_mode<synchronous>, transform_indices = @transform_6, window_bounds = array<i64: 1, 16>}, {pipeline_mode = #tpu.pipeline_mode<synchronous>, transform_indices = @transform_7, window_bounds = array<i64: 1, 16>}, {pipeline_mode = #tpu.pipeline_mode<synchronous>, transform_indices = @transform_8, window_bounds = array<i64: 1, 16>}, {pipeline_mode = #tpu.pipeline_mode<synchronous>, transform_indices = @transform_9, window_bounds = array<i64: 16, 8>}, {pipeline_mode = #tpu.pipeline_mode<synchronous>, transform_indices = @transform_10, window_bounds = array<i64: 1, 8>}, {pipeline_mode = #tpu.pipeline_mode<synchronous>, transform_indices = @transform_11, window_bounds = array<i64: 1, 8>}, {pipeline_mode = #tpu.pipeline_mode<synchronous>, transform_indices = @transform_12, window_bounds = array<i64: 1, 8>}, {pipeline_mode = #tpu.pipeline_mode<synchronous>, transform_indices = @transform_13, window_bounds = array<i64: 8, 128>}, {pipeline_mode = #tpu.pipeline_mode<synchronous>, transform_indices = @transform_14, window_bounds = array<i64: 1, 128>}, {transform_indices = @transform_15, window_bounds = array<i64: 8, 128>}]} {
    %c0 = arith.constant 0 : index
    %c0_0 = arith.constant 0 : index
    %0 = vector.load %arg1[%c0, %c0_0] : memref<8x64xbf16, #tpu.memory_space<vmem>>, vector<8x64xbf16>
    %c0_1 = arith.constant 0 : index
    %c0_2 = arith.constant 0 : index
    %1 = vector.load %arg2[%c0_1, %c0_2] : memref<64x32xbf16, #tpu.memory_space<vmem>>, vector<64x32xbf16>
    %cst = arith.constant dense<0.000000e+00> : vector<8x32xf32>
    %2 = tpu.matmul %0, %1, %cst {dimension_numbers = #tpu.dot_dimension_numbers<[1], [0], [0], [1], [0, 0, 1, 1], [], []>} : vector<8x64xbf16>, vector<64x32xbf16>, vector<8x32xf32> -> vector<8x32xf32>
    %c0_3 = arith.constant 0 : index
    %c0_4 = arith.constant 0 : index
    %3 = vector.load %arg3[%c0_3, %c0_4] : memref<1x32xf32, #tpu.memory_space<vmem>>, vector<1x32xf32>
    %4 = vector.broadcast %3 : vector<1x32xf32> to vector<8x32xf32>
    %5 = arith.addf %2, %4 : vector<8x32xf32>
    %c0_5 = arith.constant 0 : index
    %c0_6 = arith.constant 0 : index
    %6 = vector.load %arg4[%c0_5, %c0_6] : memref<1x32xf32, #tpu.memory_space<vmem>>, vector<1x32xf32>
    %c0_7 = arith.constant 0 : index
    %c0_8 = arith.constant 0 : index
    %7 = vector.load %arg5[%c0_7, %c0_8] : memref<1x32xf32, #tpu.memory_space<vmem>>, vector<1x32xf32>
    %cst_9 = arith.constant dense<0.000000e+00> : vector<8xf32>
    %8 = vector.multi_reduction <add>, %5, %cst_9 [1] : vector<8x32xf32> to vector<8xf32>
    %9 = vector.shape_cast %8 : vector<8xf32> to vector<8x1xf32>
    %cst_10 = arith.constant 3.200000e+01 : f32
    %10 = vector.broadcast %cst_10 : f32 to vector<8x1xf32>
    %11 = arith.divf %9, %10 : vector<8x1xf32>
    %12 = arith.mulf %5, %5 : vector<8x32xf32>
    %cst_11 = arith.constant dense<0.000000e+00> : vector<8xf32>
    %13 = vector.multi_reduction <add>, %12, %cst_11 [1] : vector<8x32xf32> to vector<8xf32>
    %14 = vector.shape_cast %13 : vector<8xf32> to vector<8x1xf32>
    %cst_12 = arith.constant 3.200000e+01 : f32
    %15 = vector.broadcast %cst_12 : f32 to vector<8x1xf32>
    %16 = arith.divf %14, %15 : vector<8x1xf32>
    %17 = arith.mulf %11, %11 : vector<8x1xf32>
    %18 = arith.subf %16, %17 : vector<8x1xf32>
    %19 = vector.broadcast %11 : vector<8x1xf32> to vector<8x32xf32>
    %20 = arith.subf %5, %19 : vector<8x32xf32>
    %cst_13 = arith.constant 9.99999974E-6 : f32
    %21 = vector.broadcast %cst_13 : f32 to vector<8x1xf32>
    %22 = arith.addf %18, %21 : vector<8x1xf32>
    %23 = math.rsqrt %22 : vector<8x1xf32>
    %24 = vector.broadcast %23 : vector<8x1xf32> to vector<8x32xf32>
    %25 = arith.mulf %20, %24 : vector<8x32xf32>
    %26 = vector.broadcast %6 : vector<1x32xf32> to vector<8x32xf32>
    %27 = arith.mulf %25, %26 : vector<8x32xf32>
    %28 = vector.broadcast %7 : vector<1x32xf32> to vector<8x32xf32>
    %29 = arith.addf %27, %28 : vector<8x32xf32>
    %cst_14 = arith.constant 0.000000e+00 : f32
    %30 = vector.broadcast %cst_14 : f32 to vector<8x32xf32>
    %31 = arith.maximumf %29, %30 : vector<8x32xf32>
    %32 = arith.truncf %31 : vector<8x32xf32> to vector<8x32xbf16>
    %c0_15 = arith.constant 0 : index
    %c0_16 = arith.constant 0 : index
    %33 = vector.load %arg6[%c0_15, %c0_16] : memref<32x16xbf16, #tpu.memory_space<vmem>>, vector<32x16xbf16>
    %cst_17 = arith.constant dense<0.000000e+00> : vector<8x16xf32>
    %34 = tpu.matmul %32, %33, %cst_17 {dimension_numbers = #tpu.dot_dimension_numbers<[1], [0], [0], [1], [0, 0, 1, 1], [], []>} : vector<8x32xbf16>, vector<32x16xbf16>, vector<8x16xf32> -> vector<8x16xf32>
    %c0_18 = arith.constant 0 : index
    %c0_19 = arith.constant 0 : index
    %35 = vector.load %arg7[%c0_18, %c0_19] : memref<1x16xf32, #tpu.memory_space<vmem>>, vector<1x16xf32>
    %36 = vector.broadcast %35 : vector<1x16xf32> to vector<8x16xf32>
    %37 = arith.addf %34, %36 : vector<8x16xf32>
    %c0_20 = arith.constant 0 : index
    %c0_21 = arith.constant 0 : index
    %38 = vector.load %arg8[%c0_20, %c0_21] : memref<1x16xf32, #tpu.memory_space<vmem>>, vector<1x16xf32>
    %c0_22 = arith.constant 0 : index
    %c0_23 = arith.constant 0 : index
    %39 = vector.load %arg9[%c0_22, %c0_23] : memref<1x16xf32, #tpu.memory_space<vmem>>, vector<1x16xf32>
    %cst_24 = arith.constant dense<0.000000e+00> : vector<8xf32>
    %40 = vector.multi_reduction <add>, %37, %cst_24 [1] : vector<8x16xf32> to vector<8xf32>
    %41 = vector.shape_cast %40 : vector<8xf32> to vector<8x1xf32>
    %cst_25 = arith.constant 1.600000e+01 : f32
    %42 = vector.broadcast %cst_25 : f32 to vector<8x1xf32>
    %43 = arith.divf %41, %42 : vector<8x1xf32>
    %44 = arith.mulf %37, %37 : vector<8x16xf32>
    %cst_26 = arith.constant dense<0.000000e+00> : vector<8xf32>
    %45 = vector.multi_reduction <add>, %44, %cst_26 [1] : vector<8x16xf32> to vector<8xf32>
    %46 = vector.shape_cast %45 : vector<8xf32> to vector<8x1xf32>
    %cst_27 = arith.constant 1.600000e+01 : f32
    %47 = vector.broadcast %cst_27 : f32 to vector<8x1xf32>
    %48 = arith.divf %46, %47 : vector<8x1xf32>
    %49 = arith.mulf %43, %43 : vector<8x1xf32>
    %50 = arith.subf %48, %49 : vector<8x1xf32>
    %51 = vector.broadcast %43 : vector<8x1xf32> to vector<8x16xf32>
    %52 = arith.subf %37, %51 : vector<8x16xf32>
    %cst_28 = arith.constant 9.99999974E-6 : f32
    %53 = vector.broadcast %cst_28 : f32 to vector<8x1xf32>
    %54 = arith.addf %50, %53 : vector<8x1xf32>
    %55 = math.rsqrt %54 : vector<8x1xf32>
    %56 = vector.broadcast %55 : vector<8x1xf32> to vector<8x16xf32>
    %57 = arith.mulf %52, %56 : vector<8x16xf32>
    %58 = vector.broadcast %38 : vector<1x16xf32> to vector<8x16xf32>
    %59 = arith.mulf %57, %58 : vector<8x16xf32>
    %60 = vector.broadcast %39 : vector<1x16xf32> to vector<8x16xf32>
    %61 = arith.addf %59, %60 : vector<8x16xf32>
    %cst_29 = arith.constant 0.000000e+00 : f32
    %62 = vector.broadcast %cst_29 : f32 to vector<8x16xf32>
    %63 = arith.maximumf %61, %62 : vector<8x16xf32>
    %64 = arith.truncf %63 : vector<8x16xf32> to vector<8x16xbf16>
    %c0_30 = arith.constant 0 : index
    %c0_31 = arith.constant 0 : index
    %65 = vector.load %arg10[%c0_30, %c0_31] : memref<16x8xbf16, #tpu.memory_space<vmem>>, vector<16x8xbf16>
    %cst_32 = arith.constant dense<0.000000e+00> : vector<8x8xf32>
    %66 = tpu.matmul %64, %65, %cst_32 {dimension_numbers = #tpu.dot_dimension_numbers<[1], [0], [0], [1], [0, 0, 1, 1], [], []>} : vector<8x16xbf16>, vector<16x8xbf16>, vector<8x8xf32> -> vector<8x8xf32>
    %c0_33 = arith.constant 0 : index
    %c0_34 = arith.constant 0 : index
    %67 = vector.load %arg11[%c0_33, %c0_34] : memref<1x8xf32, #tpu.memory_space<vmem>>, vector<1x8xf32>
    %68 = vector.broadcast %67 : vector<1x8xf32> to vector<8x8xf32>
    %69 = arith.addf %66, %68 : vector<8x8xf32>
    %c0_35 = arith.constant 0 : index
    %c0_36 = arith.constant 0 : index
    %70 = vector.load %arg12[%c0_35, %c0_36] : memref<1x8xf32, #tpu.memory_space<vmem>>, vector<1x8xf32>
    %c0_37 = arith.constant 0 : index
    %c0_38 = arith.constant 0 : index
    %71 = vector.load %arg13[%c0_37, %c0_38] : memref<1x8xf32, #tpu.memory_space<vmem>>, vector<1x8xf32>
    %cst_39 = arith.constant dense<0.000000e+00> : vector<8xf32>
    %72 = vector.multi_reduction <add>, %69, %cst_39 [1] : vector<8x8xf32> to vector<8xf32>
    %73 = vector.shape_cast %72 : vector<8xf32> to vector<8x1xf32>
    %cst_40 = arith.constant 8.000000e+00 : f32
    %74 = vector.broadcast %cst_40 : f32 to vector<8x1xf32>
    %75 = arith.divf %73, %74 : vector<8x1xf32>
    %76 = arith.mulf %69, %69 : vector<8x8xf32>
    %cst_41 = arith.constant dense<0.000000e+00> : vector<8xf32>
    %77 = vector.multi_reduction <add>, %76, %cst_41 [1] : vector<8x8xf32> to vector<8xf32>
    %78 = vector.shape_cast %77 : vector<8xf32> to vector<8x1xf32>
    %cst_42 = arith.constant 8.000000e+00 : f32
    %79 = vector.broadcast %cst_42 : f32 to vector<8x1xf32>
    %80 = arith.divf %78, %79 : vector<8x1xf32>
    %81 = arith.mulf %75, %75 : vector<8x1xf32>
    %82 = arith.subf %80, %81 : vector<8x1xf32>
    %83 = vector.broadcast %75 : vector<8x1xf32> to vector<8x8xf32>
    %84 = arith.subf %69, %83 : vector<8x8xf32>
    %cst_43 = arith.constant 9.99999974E-6 : f32
    %85 = vector.broadcast %cst_43 : f32 to vector<8x1xf32>
    %86 = arith.addf %82, %85 : vector<8x1xf32>
    %87 = math.rsqrt %86 : vector<8x1xf32>
    %88 = vector.broadcast %87 : vector<8x1xf32> to vector<8x8xf32>
    %89 = arith.mulf %84, %88 : vector<8x8xf32>
    %90 = vector.broadcast %70 : vector<1x8xf32> to vector<8x8xf32>
    %91 = arith.mulf %89, %90 : vector<8x8xf32>
    %92 = vector.broadcast %71 : vector<1x8xf32> to vector<8x8xf32>
    %93 = arith.addf %91, %92 : vector<8x8xf32>
    %cst_44 = arith.constant 0.000000e+00 : f32
    %94 = vector.broadcast %cst_44 : f32 to vector<8x8xf32>
    %95 = arith.maximumf %93, %94 : vector<8x8xf32>
    %96 = arith.truncf %95 : vector<8x8xf32> to vector<8x8xbf16>
    %c0_45 = arith.constant 0 : index
    %c0_46 = arith.constant 0 : index
    %97 = vector.load %arg14[%c0_45, %c0_46] : memref<8x128xbf16, #tpu.memory_space<vmem>>, vector<8x128xbf16>
    %cst_47 = arith.constant dense<0.000000e+00> : vector<8x128xf32>
    %98 = tpu.matmul %96, %97, %cst_47 {dimension_numbers = #tpu.dot_dimension_numbers<[1], [0], [0], [1], [0, 0, 1, 1], [], []>} : vector<8x8xbf16>, vector<8x128xbf16>, vector<8x128xf32> -> vector<8x128xf32>
    %c0_48 = arith.constant 0 : index
    %c0_49 = arith.constant 0 : index
    %99 = vector.load %arg15[%c0_48, %c0_49] : memref<1x128xf32, #tpu.memory_space<vmem>>, vector<1x128xf32>
    %100 = vector.broadcast %99 : vector<1x128xf32> to vector<8x128xf32>
    %101 = arith.addf %98, %100 : vector<8x128xf32>
    %c0_50 = arith.constant 0 : index
    %c0_51 = arith.constant 0 : index
    %102 = vector.load %arg16[%c0_50, %c0_51] : memref<8x128xf32, #tpu.memory_space<vmem>>, vector<8x128xf32>
    tpu.vector_store %arg16[%c0_50, %c0_51], %101 {strides = array<i32>} : memref<8x128xf32, #tpu.memory_space<vmem>>, vector<8x128xf32>,
    return
  }
  func.func @transform_0(%arg0: i32) -> (i32, i32) {
    %c0_i32 = arith.constant 0 : i32
    %c0_i32_0 = arith.constant 0 : i32
    return %arg0, %c0_i32 : i32, i32
  }
  func.func @transform_1(%arg0: i32) -> (i32, i32) {
    %c0_i32 = arith.constant 0 : i32
    %c0_i32_0 = arith.constant 0 : i32
    %c0_i32_1 = arith.constant 0 : i32
    return %c0_i32, %c0_i32_0 : i32, i32
  }
  func.func @transform_2(%arg0: i32) -> (i32, i32) {
    %c0_i32 = arith.constant 0 : i32
    %c0_i32_0 = arith.constant 0 : i32
    %c0_i32_1 = arith.constant 0 : i32
    return %c0_i32, %c0_i32_0 : i32, i32
  }
  func.func @transform_3(%arg0: i32) -> (i32, i32) {
    %c0_i32 = arith.constant 0 : i32
    %c0_i32_0 = arith.constant 0 : i32
    %c0_i32_1 = arith.constant 0 : i32
    return %c0_i32, %c0_i32_0 : i32, i32
  }
  func.func @transform_4(%arg0: i32) -> (i32, i32) {
    %c0_i32 = arith.constant 0 : i32
    %c0_i32_0 = arith.constant 0 : i32
    %c0_i32_1 = arith.constant 0 : i32
    return %c0_i32, %c0_i32_0 : i32, i32
  }
  func.func @transform_5(%arg0: i32) -> (i32, i32) {
    %c0_i32 = arith.constant 0 : i32
    %c0_i32_0 = arith.constant 0 : i32
    %c0_i32_1 = arith.constant 0 : i32
    return %c0_i32, %c0_i32_0 : i32, i32
  }
  func.func @transform_6(%arg0: i32) -> (i32, i32) {
    %c0_i32 = arith.constant 0 : i32
    %c0_i32_0 = arith.constant 0 : i32
    %c0_i32_1 = arith.constant 0 : i32
    return %c0_i32, %c0_i32_0 : i32, i32
  }
  func.func @transform_7(%arg0: i32) -> (i32, i32) {
    %c0_i32 = arith.constant 0 : i32
    %c0_i32_0 = arith.constant 0 : i32
    %c0_i32_1 = arith.constant 0 : i32
    return %c0_i32, %c0_i32_0 : i32, i32
  }
  func.func @transform_8(%arg0: i32) -> (i32, i32) {
    %c0_i32 = arith.constant 0 : i32
    %c0_i32_0 = arith.constant 0 : i32
    %c0_i32_1 = arith.constant 0 : i32
    return %c0_i32, %c0_i32_0 : i32, i32
  }
  func.func @transform_9(%arg0: i32) -> (i32, i32) {
    %c0_i32 = arith.constant 0 : i32
    %c0_i32_0 = arith.constant 0 : i32
    %c0_i32_1 = arith.constant 0 : i32
    return %c0_i32, %c0_i32_0 : i32, i32
  }
  func.func @transform_10(%arg0: i32) -> (i32, i32) {
    %c0_i32 = arith.constant 0 : i32
    %c0_i32_0 = arith.constant 0 : i32
    %c0_i32_1 = arith.constant 0 : i32
    return %c0_i32, %c0_i32_0 : i32, i32
  }
  func.func @transform_11(%arg0: i32) -> (i32, i32) {
    %c0_i32 = arith.constant 0 : i32
    %c0_i32_0 = arith.constant 0 : i32
    %c0_i32_1 = arith.constant 0 : i32
    return %c0_i32, %c0_i32_0 : i32, i32
  }
  func.func @transform_12(%arg0: i32) -> (i32, i32) {
    %c0_i32 = arith.constant 0 : i32
    %c0_i32_0 = arith.constant 0 : i32
    %c0_i32_1 = arith.constant 0 : i32
    return %c0_i32, %c0_i32_0 : i32, i32
  }
  func.func @transform_13(%arg0: i32) -> (i32, i32) {
    %c0_i32 = arith.constant 0 : i32
    %c0_i32_0 = arith.constant 0 : i32
    %c0_i32_1 = arith.constant 0 : i32
    return %c0_i32, %c0_i32_0 : i32, i32
  }
  func.func @transform_14(%arg0: i32) -> (i32, i32) {
    %c0_i32 = arith.constant 0 : i32
    %c0_i32_0 = arith.constant 0 : i32
    %c0_i32_1 = arith.constant 0 : i32
    return %c0_i32, %c0_i32_0 : i32, i32
  }
  func.func @transform_15(%arg0: i32) -> (i32, i32) {
    %c0_i32 = arith.constant 0 : i32
    %c0_i32_0 = arith.constant 0 : i32
    return %arg0, %c0_i32 : i32, i32
  }
}

</mosaic_0001>

<bundles_post_ra>
// kernel: tpu_custom_call.1
= control target key start
LH: loop header
LB: loop body
LE: loop exit
PB: predicated region body
PF: predicated region fallthrough
CT: control target
= control target key end

     0   :  { %v540_v1 = vmov 0.0   ;;  %vm541_vm0 = vmmov 0   ;;  %s705_s0 = inlined_call_operand.vmem [shape: bf16[8,64], index: 0, kind: input, shape index: {}]   ;;  %s706_s1 = inlined_call_operand.vmem [shape: bf16[64,32], index: 1, kind: input, shape index: {}]   ;;  %s707_s2 = inlined_call_operand.vmem [shape: f32[1,32], index: 2, kind: input, shape index: {}]   ;;  %s708_s3 = inlined_call_operand.vmem [shape: f32[1,32], index: 3, kind: input, shape index: {}]   ;;  %s709_s4 = inlined_call_operand.vmem [shape: f32[1,32], index: 4, kind: input, shape index: {}]   ;;  %s710_s5 = inlined_call_operand.vmem [shape: bf16[32,16], index: 5, kind: input, shape index: {}]   ;;  %s711_s6 = inlined_call_operand.vmem [shape: f32[1,16], index: 6, kind: input, shape index: {}]   ;;  %s712_s7 = inlined_call_operand.vmem [shape: f32[1,16], index: 7, kind: input, shape index: {}]   ;;  %s713_s8 = inlined_call_operand.vmem [shape: f32[1,16], index: 8, kind: input, shape index: {}]   ;;  %s714_s9 = inlined_call_operand.vmem [shape: bf16[16,8], index: 9, kind: input, shape index: {}]   ;;  %s715_s10 = inlined_call_operand.vmem [shape: f32[1,8], index: 10, kind: input, shape index: {}]   ;;  %s716_s11 = inlined_call_operand.vmem [shape: f32[1,8], index: 11, kind: input, shape index: {}]   ;;  %s717_s12 = inlined_call_operand.vmem [shape: f32[1,8], index: 12, kind: input, shape index: {}]   ;;  %s718_s13 = inlined_call_operand.vmem [shape: bf16[8,128], index: 13, kind: input, shape index: {}]   ;;  %s719_s14 = inlined_call_operand.vmem [shape: f32[1,128], index: 14, kind: input, shape index: {}]   ;;  %s720_s15 = inlined_call_operand.hbm [shape: f32[8,128], index: 15, kind: output, shape index: {}]  }
   0x1   :  { %v503_v0 = vld [vmem:[%s706_s1] sm:$0xff]   ;;  %468 = vmatprep.subr.bf16.mxu0 %v540_v1  ;;  %480 = vmatprep.subr.bf16.mxu1 %v540_v1  ;;  %v504_v2 = vld [vmem:[%s706_s1 + $0x8] sm:$0xff]   ;;  %v505_v3 = vld [vmem:[%s706_s1 + $0x10] sm:$0xff]  }
   0x2   :  { %469 = vmatpush3.bf16.msra.mxu0 %v503_v0  ;;  %476 = vmatprep.mubr.msk.bf16.mxu0 %vm541_vm0, %v540_v1 }
   0x3   :  { %470 = vmatprep.subr.bf16.mxu0 %v540_v1  ;;  %484 = vmatprep.mubr.msk.bf16.mxu1 %vm541_vm0, %v540_v1 }
   0x6   :  { %471 = vmatpush3.bf16.msra.mxu0 %v504_v2 }
   0x7   :  { %20 = vsyncpa [#allocation3], 0  ;;  %472 = vmatprep.subr.bf16.mxu0 %v540_v1  ;;  %v506_v4 = vld [vmem:[%s706_s1 + $0x18] sm:$0xff]   ;;  %v52_v5 = vld [vmem:[%s705_s0] sm:$0xf]  ;;  %vm92_vm1 = vcmask 523264  }
   0x8   :  { %v435_v6 = vld [vmem:[%s707_s2] ss:$0 sm:$0xff]  ;;  %vm138_vm2 = vcmask 261120   ;;  %v508_v16 = vld [vmem:[%s710_s5 + $0x8] sm:$0xff]   ;;  %vm239_vm3 = vcmask 130048   ;;  %vm332_vm4 = vcmask 64512  }
   0x9   :  { %v507_v15 = vld [vmem:[%s710_s5] sm:$0xff]   ;;  %vm376_vm5 = vcmask 1043456   ;;  %s542_s29 = smov [#allocation2]  }
   0xa   :  { %473 = vmatpush3.bf16.msra.mxu0 %v505_v3  ;;  %481 = vmatpush3.bf16.msra.mxu1 %v507_v15  ;;  %v441_v26 = vld [vmem:[%s708_s3] ss:$0 sm:$0xff]  ;;  %s427_s0 = sshll.u32 %s542_s29, 4  ;;  %s428_s0 = int_to_ptr.vmem [resolvable:$true] %s427_s0 }
   0xb   :  { %474 = vmatprep.subr.bf16.mxu0 %v540_v1  ;;  %482 = vmatprep.subr.bf16.mxu1 %v540_v1  ;;  %v442_v28 = vld [vmem:[%s709_s4] ss:$0 sm:$0xff]  ;;  %p521_p1 = scmp.lt.s32.totalorder %s428_s0, %s428_s0 }
   0xc   :  { %v443_v33 = vld [vmem:[%s711_s6] ss:$0 sm:$0xff] }
   0xd   :  { %v509_v42 = vld [vmem:[%s714_s9] sm:$0xff]  }
   0xe   :  { %475 = vmatpush3.bf16.msra.mxu0 %v506_v4  ;;  %483 = vmatpush3.bf16.msra.mxu1 %v508_v16  ;;  %v447_v52 = vld [vmem:[%s712_s7] ss:$0 sm:$0xff] }
   0xf   :  { %494 = vmatprep.subr.bf16.mxu0 %v540_v1  ;;  %488 = vmatprep.subr.bf16.mxu1 %v540_v1  ;;  %v448_v54 = vld [vmem:[%s713_s8] ss:$0 sm:$0xff] }
  0x10   :  { %v449_v59 = vld [vmem:[%s715_s10] ss:$0 sm:$0xff] }
  0x11   :  { %477 = vmatmul.mubr.msk.bf16.vlgmr.msra.gmra.mrb[0].mxu0 %vm92_vm1, %v52_v5  ;;  %v365_v4 = vld [vmem:[%s718_s13] sm:$0xf] }
  0x12   :  { %496 = vmatprep.mubr.msk.bf16.mxu0 %vm541_vm0, %v540_v1  ;;  %v378_v5 = vsel %vm376_vm5, %v365_v4, 0  ;;  %v452_v15 = vld [vmem:[%s716_s11] ss:$0 sm:$0xff]  ;;  %s516_s11 = scalar_lea.vmem %s428_s0, 128 }
  0x13   :  { %495 = vmatpush3.bf16.msra.mxu0 %v378_v5  ;;  %p517_p0 = scmp.ne.s32.totalorder %s428_s0, %s516_s11  ;;  %p522_p2 = scmp.lt.s32.totalorder %s516_s11, %s516_s11 }
  0x15   :  { %p523_p3 = por %p522_p2, %p521_p1 }
  0x17   :  { %p524_p4 = pnand %p523_p3, %p517_p0 }
  0xe4   :  { %v130_v7 = vpop.f32.mrb[0].mxu0 }
  0xe5   :  { %v131_v8 = vadd.f32 %v435_v6, %v130_v7  ;;  %v478_v9 = vpop.f32.mrb[1].mxu0 }
  0xe6   :  { %v133_v10 = vpop.f32.mrb[2].mxu0 }
  0xe7   :  { %v479_v11 = vpop.f32.mrb[3].mxu0  ;;  %v139_v12 = vsel %vm138_vm2, %v131_v8, 0.0  ;;  %v144_v13 = vmul.f32 %v131_v8, %v131_v8 }
  0xe8   :  { %140 = vadd.xlane.f32.xlu0 %v139_v12 }
  0xe9   :  { %v145_v14 = vsel %vm138_vm2, %v144_v13, 0.0 }
  0xec   :  { %146 = vadd.xlane.f32.xlu0 %v145_v14 }
 0x175   :  { %v141_v17 = vpop.xlane.xlu0 %140 }
 0x176   :  { %v143_v18 = vmul.f32 0.03125, %v141_v17  ;;  %v453_v17 = vld [vmem:[%s717_s12] ss:$0 sm:$0xff] }
 0x178   :  { %v149_v20 = vmul.f32 %v143_v18, %v143_v18  ;;  %v151_v24 = vsub.f32 %v131_v8, %v143_v18 }
 0x179   :  { %v147_v19 = vpop.xlane.xlu0 %146 }
 0x17a   :  { %v148_v21 = vmul.f32 0.03125, %v147_v19 }
 0x17c   :  { %v150_v22 = vsub.f32 %v148_v21, %v149_v20 }
 0x17e   :  { %v152_v23 = vadd.f32 1e-05, %v150_v22  ;;  %v454_v22 = vld [vmem:[%s719_s14] ss:$0 sm:$0xff] }
 0x180   :  { %510 = vrsqrt.f32 %v152_v23 }
 0x18a   :  { %v511_v25 = vpop.eup %510 }
 0x18b   :  { %v154_v27 = vmul.f32 %v511_v25, %v151_v24 }
 0x18d   :  { %v161_v29 = vmul.f32 %v441_v26, %v154_v27 }
 0x18f   :  { %v168_v30 = vadd.f32 %v442_v28, %v161_v29 }
 0x191   :  { %v169_v31 = vmax.f32 %v168_v30, 0.0 }
 0x193   :  { %v170_v32 = vpack.c.bf16 %v169_v31, %v169_v31 }
 0x195   :  { %485 = vmatmul.mubr.msk.bf16.vlgmr.msra.gmra.mrb[0].mxu1 %vm138_vm2, %v170_v32 }
 0x196   :  { %490 = vmatprep.mubr.msk.bf16.mxu1 %vm541_vm0, %v540_v1  ;;  %489 = vmatpush3.bf16.msra.mxu1 %v509_v42 }
 0x268   :  { %v231_v34 = vpop.f32.mrb[0].mxu1 }
 0x269   :  { %v232_v35 = vadd.f32 %v443_v33, %v231_v34  ;;  %v486_v36 = vpop.f32.mrb[1].mxu1 }
 0x26a   :  { %v234_v37 = vpop.f32.mrb[2].mxu1 }
 0x26b   :  { %v487_v38 = vpop.f32.mrb[3].mxu1  ;;  %v240_v39 = vsel %vm239_vm3, %v232_v35, 0.0  ;;  %v245_v40 = vmul.f32 %v232_v35, %v232_v35 }
 0x26c   :  { %241 = vadd.xlane.f32.xlu1 %v240_v39 }
 0x26d   :  { %v246_v41 = vsel %vm239_vm3, %v245_v40, 0.0 }
 0x270   :  { %247 = vadd.xlane.f32.xlu1 %v246_v41 }
 0x2f9   :  { %v242_v43 = vpop.xlane.xlu1 %241 }
 0x2fa   :  { %v244_v44 = vmul.f32 0.0625, %v242_v43 }
 0x2fc   :  { %v250_v46 = vmul.f32 %v244_v44, %v244_v44  ;;  %v252_v50 = vsub.f32 %v232_v35, %v244_v44 }
 0x2fd   :  { %v248_v45 = vpop.xlane.xlu1 %247 }
 0x2fe   :  { %v249_v47 = vmul.f32 0.0625, %v248_v45 }
 0x300   :  { %v251_v48 = vsub.f32 %v249_v47, %v250_v46 }
 0x302   :  { %v253_v49 = vadd.f32 1e-05, %v251_v48 }
 0x304   :  { %512 = vrsqrt.f32 %v253_v49 }
 0x30e   :  { %v513_v51 = vpop.eup %512 }
 0x30f   :  { %v255_v53 = vmul.f32 %v513_v51, %v252_v50 }
 0x311   :  { %v262_v55 = vmul.f32 %v447_v52, %v255_v53 }
 0x313   :  { %v269_v56 = vadd.f32 %v448_v54, %v262_v55 }
 0x315   :  { %v270_v57 = vmax.f32 %v269_v56, 0.0 }
 0x317   :  { %v271_v58 = vpack.c.bf16 %v270_v57, %v270_v57 }
 0x319   :  { %491 = vmatmul.mubr.msk.bf16.vlgmr.msra.gmra.mrb[4].mxu1 %vm239_vm3, %v271_v58 }
 0x3ec   :  { %v324_v60 = vpop.f32.mrb[4].mxu1 }
 0x3ed   :  { %v325_v61 = vadd.f32 %v449_v59, %v324_v60  ;;  %v492_v62 = vpop.f32.mrb[5].mxu1 }
 0x3ee   :  { %v327_v63 = vpop.f32.mrb[6].mxu1 }
 0x3ef   :  { %v493_v0 = vpop.f32.mrb[7].mxu1  ;;  %v333_v1 = vsel %vm332_vm4, %v325_v61, 0.0  ;;  %v338_v2 = vmul.f32 %v325_v61, %v325_v61 }
 0x3f0   :  { %334 = vadd.xlane.f32.xlu0 %v333_v1 }
 0x3f1   :  { %v339_v3 = vsel %vm332_vm4, %v338_v2, 0.0 }
 0x3f2   :  { %340 = vadd.xlane.f32.xlu1 %v339_v3 }
 0x47d   :  { %v335_v6 = vpop.xlane.xlu0 %334 }
 0x47e   :  { %v337_v7 = vmul.f32 0.125, %v335_v6 }
 0x47f   :  { %v341_v8 = vpop.xlane.xlu1 %340 }
 0x480   :  { %v343_v9 = vmul.f32 %v337_v7, %v337_v7  ;;  %v342_v10 = vmul.f32 0.125, %v341_v8  ;;  %v345_v13 = vsub.f32 %v325_v61, %v337_v7 }
 0x482   :  { %v344_v11 = vsub.f32 %v342_v10, %v343_v9 }
 0x484   :  { %v346_v12 = vadd.f32 1e-05, %v344_v11 }
 0x486   :  { %514 = vrsqrt.f32 %v346_v12 }
 0x490   :  { %v515_v14 = vpop.eup %514 }
 0x491   :  { %v348_v16 = vmul.f32 %v515_v14, %v345_v13 }
 0x493   :  { %v355_v18 = vmul.f32 %v452_v15, %v348_v16 }
 0x495   :  { %v362_v19 = vadd.f32 %v453_v17, %v355_v18 }
 0x497   :  { %v363_v20 = vmax.f32 %v362_v19, 0.0 }
 0x499   :  { %v364_v21 = vpack.c.bf16 %v363_v20, %v363_v20 }
 0x49b   :  { %497 = vmatmul.mubr.msk.bf16.vlgmr.msra.gmra.mrb[4].mxu0 %vm332_vm4, %v364_v21 }
 0x56e   :  { %v414_v23 = vpop.f32.mrb[4].mxu0 }
 0x56f   :  { %v415_v24 = vadd.f32 %v454_v22, %v414_v23  ;;  %v498_v25 = vpop.f32.mrb[5].mxu0 }
 0x570   :  { %v417_v26 = vpop.f32.mrb[6].mxu0 }
 0x571   :  { %420 = vst [vmem:[#allocation2] sm:$0xff] %v415_v24  ;;  %v499_v27 = vpop.f32.mrb[7].mxu0 }
 0x572   :  { %527 = shalt.err (!%p524_p4)
}
 0x573   :  { %s528_s14 = scalar_lea.hbm %s720_s15, 128 }
 0x574   :  { %p529_p5 = scmp.ne.s32.totalorder %s720_s15, %s528_s14  ;;  %p532_p6 = scmp.lt.u32.totalorder %s528_s14, %s720_s15 }
 0x576   :  { %p534_p7 = pnand %p532_p6, %p529_p5 }
 0x578   :  { %537 = shalt.err (!%p534_p7)
}
 0x579   :  { %430 = dma.vmem_to_hbm [thread:$0]  %s428_s0, 128, %s720_s15, [#allocation3]  }
 0x57a   :  { %538 = dma.done.wait [#allocation3], 128  }
 0x57b   :  { %539 = vsyncadd [#allocation3], 4294967168 }
 0x57c   :  { %434 = vsyncpa [#allocation3], 1 }

</bundles_post_ra>
